<compile_context>
chip_gen: v5e
topology: v5e:2x2
jax: 0.10.0
libtpu: 0.0.40
codegen_flags: <defaults>
</compile_context>

<pallas_src>
import functools

import jax
import jax.numpy as jnp
from jax.experimental import pallas as pl
from jax.experimental.pallas import tpu as pltpu

N_CLASSES = 2
N_PAD = 128  # lane-dense output width (multiple of 128)


def _linear_kernel(x_ref, w_ref, b_ref, o_ref):
    # One batch tile: [TB, D] @ [D, 128] on the MXU with f32 accumulation,
    # then bias add on the VPU. Bias block is (1, 128) and broadcasts.
    acc = jnp.dot(x_ref[...], w_ref[...], preferred_element_type=jnp.float32)
    o_ref[...] = (acc + b_ref[...]).astype(o_ref.dtype)


def _round_up(n, m):
    return ((n + m - 1) // m) * m


def prepare_params(weight, bias):
    """One-time parameter prep (call ONCE, outside the per-step forward).

    weight: [2, D] float32 (PyTorch nn.Linear layout)
    bias:   [2]    float32
    returns (w_pad [D, 128], b_pad [1, 128]) — transposed + lane-padded.
    """
    D = weight.shape[1]
    w_pad = jnp.zeros((D, N_PAD), jnp.float32).at[:, :N_CLASSES].set(weight.T)
    b_pad = jnp.zeros((1, N_PAD), jnp.float32).at[:, :N_CLASSES].set(bias)
    return w_pad, b_pad


@functools.partial(jax.jit, static_argnames=("tb",))
def simple_classifier_forward(x, w_pad, b_pad, *, tb=512):
    """Pallas forward for nn.Linear(input_dim, 2).

    x:     [B, D] float32
    w_pad: [D, 128] float32 (from prepare_params)
    b_pad: [1, 128] float32 (from prepare_params)
    returns [B, 2] float32
    """
    B, D = x.shape
    # Batch tile: `tb` rows when B is large (good DMA pipelining), otherwise
    # the whole (8-aligned) batch. Always a multiple of 8 (sublane).
    TB = min(tb, _round_up(B, 8))
    Bp = pl.cdiv(B, TB) * TB
    if Bp != B:
        x = jnp.pad(x, ((0, Bp - B), (0, 0)))

    n_tiles = Bp // TB
    cost = pl.CostEstimate(
        flops=2 * Bp * D * N_PAD,
        transcendentals=0,
        bytes_accessed=4 * (Bp * D + D * N_PAD + N_PAD + Bp * N_PAD),
    )

    out = pl.pallas_call(
        _linear_kernel,
        out_shape=jax.ShapeDtypeStruct((Bp, N_PAD), jnp.float32),
        grid_spec=pltpu.PrefetchScalarGridSpec(
            num_scalar_prefetch=0,
            grid=(n_tiles,),
            in_specs=[
                pl.BlockSpec((TB, D), lambda i: (i, 0)),      # x tile (pipelined)
                pl.BlockSpec((D, N_PAD), lambda i: (0, 0)),   # weights (VMEM-resident)
                pl.BlockSpec((1, N_PAD), lambda i: (0, 0)),   # bias (VMEM-resident)
            ],
            out_specs=pl.BlockSpec((TB, N_PAD), lambda i: (i, 0)),
        ),
        compiler_params=pltpu.CompilerParams(
            dimension_semantics=("parallel",),      # shard batch tiles across TCs (v7x)
            vmem_limit_bytes=32 * 1024 * 1024,      # headroom under v7x's 64 MiB VMEM
        ),
        cost_estimate=cost,
    )(x, w_pad, b_pad)

    # Drop batch padding and the padded output lanes.
    return out[:B, :N_CLASSES]
    # TODO(synk): at tiny B/D this head is launch-overhead bound; fusing it into
    # the upstream kernel's epilogue (or plain XLA dot+add) would beat any
    # standalone kernel.


if __name__ == "__main__":
    key = jax.random.PRNGKey(0)
    kx, kw, kb = jax.random.split(key, 3)

    B = 8           # batch of "email lines"
    input_dim = 32  # feature dimension

    x = jax.random.normal(kx, (B, input_dim), dtype=jnp.float32)
    # Deterministic synthetic params matching nn.Linear(input_dim, 2) shapes.
    weight = jax.random.normal(kw, (2, input_dim), dtype=jnp.float32) * 0.1
    bias = jax.random.normal(kb, (2,), dtype=jnp.float32) * 0.1

    # One-time param prep (removes the per-call transpose from the hot path).
    w_pad, b_pad = prepare_params(weight, bias)

    out = simple_classifier_forward(x, w_pad, b_pad)
    out = jax.block_until_ready(out)

    # Reference check (same semantics as torch nn.Linear).
    ref = x @ weight.T + bias
    assert out.shape == (B, 2)
    assert jnp.allclose(out, ref, atol=1e-5), "mismatch vs reference"

    print("KERNEL_OK")
</pallas_src>

<mosaic_0001>
module attributes {stable_mosaic.version = 11 : i64} {
  func.func @_linear_kernel(%arg0: i32, %arg1: memref<8x32xf32, #tpu.memory_space<vmem>>, %arg2: memref<32x128xf32, #tpu.memory_space<vmem>>, %arg3: memref<1x128xf32, #tpu.memory_space<vmem>>, %arg4: memref<8x128xf32, #tpu.memory_space<vmem>>) attributes {dimension_semantics = [#tpu.dimension_semantics<parallel>], iteration_bounds = array<i64: 1>, scalar_prefetch = 0 : i64, scratch_operands = 0 : i64, tpu.core_type = #tpu.core_type<tc>, window_params = [{transform_indices = @transform_0, window_bounds = array<i64: 8, 32>}, {pipeline_mode = #tpu.pipeline_mode<synchronous>, transform_indices = @transform_1, window_bounds = array<i64: 32, 128>}, {pipeline_mode = #tpu.pipeline_mode<synchronous>, transform_indices = @transform_2, window_bounds = array<i64: 1, 128>}, {transform_indices = @transform_3, window_bounds = array<i64: 8, 128>}]} {
    %c0 = arith.constant 0 : index
    %c0_0 = arith.constant 0 : index
    %0 = vector.load %arg1[%c0, %c0_0] : memref<8x32xf32, #tpu.memory_space<vmem>>, vector<8x32xf32>
    %c0_1 = arith.constant 0 : index
    %c0_2 = arith.constant 0 : index
    %1 = vector.load %arg2[%c0_1, %c0_2] : memref<32x128xf32, #tpu.memory_space<vmem>>, vector<32x128xf32>
    %cst = arith.constant dense<0.000000e+00> : vector<8x128xf32>
    %2 = tpu.matmul %0, %1, %cst {dimension_numbers = #tpu.dot_dimension_numbers<[1], [0], [0], [1], [0, 0, 1, 1], [], []>} : vector<8x32xf32>, vector<32x128xf32>, vector<8x128xf32> -> vector<8x128xf32>
    %c0_3 = arith.constant 0 : index
    %c0_4 = arith.constant 0 : index
    %3 = vector.load %arg3[%c0_3, %c0_4] : memref<1x128xf32, #tpu.memory_space<vmem>>, vector<1x128xf32>
    %4 = vector.broadcast %3 : vector<1x128xf32> to vector<8x128xf32>
    %5 = arith.addf %2, %4 : vector<8x128xf32>
    %c0_5 = arith.constant 0 : index
    %c0_6 = arith.constant 0 : index
    %6 = vector.load %arg4[%c0_5, %c0_6] : memref<8x128xf32, #tpu.memory_space<vmem>>, vector<8x128xf32>
    tpu.vector_store %arg4[%c0_5, %c0_6], %5 {strides = array<i32>} : memref<8x128xf32, #tpu.memory_space<vmem>>, vector<8x128xf32>,
    return
  }
  func.func @transform_0(%arg0: i32) -> (i32, i32) {
    %c0_i32 = arith.constant 0 : i32
    %c0_i32_0 = arith.constant 0 : i32
    return %arg0, %c0_i32 : i32, i32
  }
  func.func @transform_1(%arg0: i32) -> (i32, i32) {
    %c0_i32 = arith.constant 0 : i32
    %c0_i32_0 = arith.constant 0 : i32
    %c0_i32_1 = arith.constant 0 : i32
    return %c0_i32, %c0_i32_0 : i32, i32
  }
  func.func @transform_2(%arg0: i32) -> (i32, i32) {
    %c0_i32 = arith.constant 0 : i32
    %c0_i32_0 = arith.constant 0 : i32
    %c0_i32_1 = arith.constant 0 : i32
    return %c0_i32, %c0_i32_0 : i32, i32
  }
  func.func @transform_3(%arg0: i32) -> (i32, i32) {
    %c0_i32 = arith.constant 0 : i32
    %c0_i32_0 = arith.constant 0 : i32
    return %arg0, %c0_i32 : i32, i32
  }
}

</mosaic_0001>

<bundles_post_ra>
// kernel: simple_classifier_forward.1
= control target key start
LH: loop header
LB: loop body
LE: loop exit
PB: predicated region body
PF: predicated region fallthrough
CT: control target
= control target key end

     0   :  { %8 = vsyncpa [#allocation3], 0  ;;  %s178_s0 = inlined_call_operand.hbm [shape: f32[8,32], index: 0, kind: input, shape index: {}]   ;;  %s179_s1 = inlined_call_operand.hbm [shape: f32[32,128], index: 1, kind: input, shape index: {}]   ;;  %s180_s2 = inlined_call_operand.vmem [shape: f32[1,128], index: 2, kind: input, shape index: {}]   ;;  %s181_s3 = inlined_call_operand.vmem [shape: f32[8,128], index: 3, kind: output, shape index: {}]  }
   0x1   :  { %s15_s14 = sshll.u32 %s178_s0, 4  ;;  %s16_s14 = int_to_ptr.hbm [resolvable:$true] %s15_s14 }
   0x2   :  { %9 = vsyncpa [#allocation5], 0  ;;  %s142_s15 = smov [#allocation2]   ;;  %s25_s19 = sshll.u32 %s179_s1, 4  ;;  %s26_s19 = int_to_ptr.hbm [resolvable:$true] %s25_s19 }
   0x3   :  { %s17_s16 = sshll.u32 %s142_s15, 4  ;;  %s143_s20 = smov [#allocation4]   ;;  %s18_s16 = int_to_ptr.vmem [resolvable:$true] %s17_s16 }
   0x4   :  { %20 = dma.hbm_to_vmem [thread:$0]  %s16_s14, 128, %s18_s16, [#allocation3]  }
   0x5   :  { %s27_s21 = sshll.u32 %s143_s20, 4  ;;  %s144_s22 = smov 128   ;;  %s28_s21 = int_to_ptr.vmem [resolvable:$true] %s27_s21 }
   0x6   :  { %s145_s23 = smov 8  }
   0x7   :  { %33 = dma.hbm_to_vmem [thread:$0]  %s26_s19, 512, %s28_s21, [#allocation5], %s144_s22, %s144_s22, %s145_s23  }
   0x8   :  { %138 = dma.done.wait [#allocation3], 128  }
   0x9   :  { %139 = vsyncadd [#allocation3], 4294967168 }
   0xa   :  { %140 = dma.done.wait [#allocation5], 512  }
   0xb   :  { %141 = vsyncadd [#allocation5], 4294966784  ;;  %v48_v0 = vld [vmem:[#allocation4 + $0x18] sm:$0xff]  ;;  %v47_v1 = vld [vmem:[#allocation4 + $0x10] sm:$0xff]  ;;  %vm53_vm0 = vcmask 261120  }
   0xc   :  { %69 = vmatpush.msra.mxu0 %v48_v0  ;;  %v46_v2 = vld [vmem:[#allocation4 + $0x8] sm:$0xff]  ;;  %v45_v3 = vld [vmem:[#allocation4] sm:$0xff]  ;;  %v44_v4 = vld [vmem:[#allocation2] sm:$0xff] }
   0xd   :  { %v89_v5 = vld [vmem:[%s180_s2] ss:$0 sm:$0xff] }
   0xe   :  { %70 = vmatpush.msra.mxu0 %v47_v1 }
  0x10   :  { %71 = vmatpush.msra.mxu0 %v46_v2 }
  0x12   :  { %72 = vmatpush.msra.mxu0 %v45_v3 }
  0x13   :  { %84 = vmatmul.msk.f32.vlgmr.msra.gmra.mxu0 %vm53_vm0, %v44_v4 }
  0x90   :  { %v74_v6 = vpop.f32.mrf.mxu0 }
  0x91   :  { %v75_v7 = vadd.f32 %v89_v5, %v74_v6 }
  0x93   :  { %77 = vst [vmem:[%s181_s3] sm:$0xff] %v75_v7 }
  0x94   :  { %82 = vsyncpa [#allocation3], 1 }
  0x95   :  { %83 = vsyncpa [#allocation5], 1 }

</bundles_post_ra>
